<compile_context>
chip_gen: v5e
topology: v5e:2x2
jax: 0.10.0
libtpu: 0.0.40
codegen_flags: <defaults>
</compile_context>

<pallas_src>
import numpy as np
import jax
import jax.numpy as jnp
from jax import lax
from jax.experimental import pallas as pl
from jax.experimental.pallas import tpu as pltpu


# ----------------------------------------------------------------------------
# Symmetry transforms (same as get_symmetry_tfs(): rz in {0, pi}, no translation)
# ----------------------------------------------------------------------------
def _rot_z(rz):
    c, s = np.cos(rz), np.sin(rz)
    return np.array([[c, -s, 0.0],
                     [s,  c, 0.0],
                     [0.0, 0.0, 1.0]], dtype=np.float64)


def get_symmetry_rotations():
    # Only the 3x3 rotation block matters (translation of the 4x4 tfs is zero).
    return np.stack([_rot_z(0.0), _rot_z(np.pi)], axis=0).astype(np.float32)  # [2,3,3]


# ----------------------------------------------------------------------------
# Tiling helper
# ----------------------------------------------------------------------------
def _pick_tile_rows(rows, max_tile):
    """Pick a row-tile <= max_tile.

    Prefers a large exact divisor (multiple of 8, >= max(1024, max_tile/2)) so
    there is no ragged tail; otherwise returns max_tile and the kernel masks
    the out-of-range rows of the last block.  Never returns a degenerate tiny
    tile (the old exact-divisor search could return 8-row tiles)."""
    max_tile = max(8, (max_tile // 8) * 8)
    if rows <= max_tile:
        return rows                      # single tile: full-dim exemption
    floor = max(1024, max_tile // 2)
    for t in range(max_tile, floor - 1, -8):
        if rows % t == 0:
            return t                     # exact divisor, no masked tail
    return max_tile                      # masked ragged tail in-kernel


# ----------------------------------------------------------------------------
# Pallas kernel
# ----------------------------------------------------------------------------
def _make_kernel(tile_rows, bins, n_sym, rows_true, needs_mask):
    def kernel(pred_ref, idx_ref, out_ref):
        # pred_ref: [1, tile_rows, bins]  (native dtype; row = point*3 + channel)
        # idx_ref:  [1, tile_rows, n_sym] i32  target bin per symmetry
        # out_ref:  [1, 1, n_sym]         f32  accumulator: sum_rows (lse - sel)
        t = pl.program_id(1)

        @pl.when(t == 0)
        def _():
            out_ref[...] = jnp.zeros_like(out_ref)

        # Cast in-kernel so bf16 pred streams at half the HBM bytes.
        logits = pred_ref[0].astype(jnp.float32)                    # [TR, bins]

        # log-sum-exp per row -- computed ONCE, shared across all symmetries.
        m = jnp.max(logits, axis=-1, keepdims=True)                 # [TR, 1]
        lse = m + jnp.log(jnp.sum(jnp.exp(logits - m),
                                  axis=-1, keepdims=True))          # [TR, 1]

        if needs_mask:
            # Rows past rows_true (garbage tail of the last partial block) are
            # select-masked on the WHOLE per-row term, so NaN/Inf garbage from
            # the undefined VMEM region can never reach the reduction.
            rid = t * tile_rows + lax.broadcasted_iota(
                jnp.int32, (tile_rows, 1), 0)
            valid = rid < rows_true

        # one iota, hoisted out of the symmetry loop
        iota = lax.broadcasted_iota(jnp.int32, (tile_rows, bins), 1)

        parts = []
        for s in range(n_sym):
            idx_s = idx_ref[0, :, s:s + 1]                          # [TR, 1]
            sel = jnp.where(iota == idx_s, logits, 0.0)             # [TR, bins]
            term = lse - jnp.sum(sel, axis=-1, keepdims=True)       # [TR, 1]
            if needs_mask:
                term = jnp.where(valid, term, 0.0)
            parts.append(jnp.sum(term, axis=0, keepdims=True))      # (1, 1)

        partial = jnp.concatenate(parts, axis=-1)                   # (1, n_sym)
        out_ref[...] += partial[None]                               # (1, 1, n_sym)

    return kernel


# ----------------------------------------------------------------------------
# Wrapper
# ----------------------------------------------------------------------------
def nocs_min_symmetry_ce_loss(pred, target, ce_loss_bins=100, max_tile_rows=4096):
    """pred: [B, N, 3*bins] (f32 or bf16), target: [B, N, 3] in [0,1] -> scalar f32."""
    B, N, _ = target.shape
    bins = ce_loss_bins
    sym = get_symmetry_rotations()                                  # [S, 3, 3]
    S = sym.shape[0]
    rows = N * 3

    # Free, contiguous reshape; keep pred's native dtype (no HBM pre-pass).
    pred_rows = pred.reshape(B, rows, bins)

    # Target bin classes for every symmetry (tiny: ~2% of pred's bytes).
    centered = target.astype(jnp.float32) - 0.5                     # [B, N, 3]
    tmp = jnp.einsum('scj,bnj->bncs', jnp.asarray(sym), centered) + 0.5  # [B,N,3,S]
    bin_idx = jnp.clip(tmp * bins, 0.0, float(bins - 1)).astype(jnp.int32)
    bin_idx = bin_idx.reshape(B, rows, S)                           # [B, rows, S]

    tile_rows = _pick_tile_rows(rows, max_tile_rows)
    n_tiles = pl.cdiv(rows, tile_rows)
    needs_mask = (rows % tile_rows) != 0

    kernel = _make_kernel(tile_rows, bins, S, rows, needs_mask)

    out = pl.pallas_call(
        kernel,
        out_shape=jax.ShapeDtypeStruct((B, 1, S), jnp.float32),
        grid=(B, n_tiles),
        in_specs=[
            pl.BlockSpec((1, tile_rows, bins), lambda b, t: (b, t, 0)),
            pl.BlockSpec((1, tile_rows, S), lambda b, t: (b, t, 0)),
        ],
        out_specs=pl.BlockSpec((1, 1, S), lambda b, t: (b, 0, 0)),
        compiler_params=pltpu.CompilerParams(
            dimension_semantics=("parallel", "arbitrary"),
            vmem_limit_bytes=32 * 1024 * 1024),
    )(pred_rows, bin_idx)

    # out[b, 0, s] = sum over valid rows of (lse - selected_logit)
    loss_bs = out[:, 0, :] / N                      # mean over points, sum over xyz
    return jnp.min(loss_bs, axis=-1).mean()         # min over symmetries, mean over batch


# ----------------------------------------------------------------------------
# Pure-JAX reference (mirrors the PyTorch forward) for a correctness check
# ----------------------------------------------------------------------------
def reference_loss(pred, target, ce_loss_bins=100):
    B, N, _ = target.shape
    bins = ce_loss_bins
    sym = jnp.asarray(get_symmetry_rotations())                     # [S, 3, 3]
    S = sym.shape[0]
    pred = pred.astype(jnp.float32)
    target = target.astype(jnp.float32)
    centered = target - 0.5
    tmp = jnp.einsum('sij,bnj->bsni', sym, centered) + 0.5          # [B, S, N, 3]
    bin_idx = jnp.clip(tmp * bins, 0.0, bins - 1).astype(jnp.int32)
    logits = pred.reshape(B, N, 3, bins)
    logp = jax.nn.log_softmax(logits, axis=-1)
    logp_b = jnp.broadcast_to(logp[:, None], (B, S, N, 3, bins))
    ce = -jnp.take_along_axis(logp_b, bin_idx[..., None], axis=-1)[..., 0]
    loss = ce.sum(-1).mean(-1)                                      # [B, S]
    return jnp.min(loss, axis=1).mean()


if __name__ == "__main__":
    bins = 100
    base_key = jax.random.PRNGKey(0)

    def check(seed, B, N, max_tile_rows, dtype=jnp.float32, atol=1e-4):
        k1, k2 = jax.random.split(jax.random.fold_in(base_key, seed))
        pred = jax.random.normal(k1, (B, N, 3 * bins), dtype=jnp.float32).astype(dtype)
        target = jax.random.uniform(k2, (B, N, 3), dtype=jnp.float32)
        loss = jax.block_until_ready(
            nocs_min_symmetry_ce_loss(pred, target, bins, max_tile_rows=max_tile_rows))
        ref = jax.block_until_ready(reference_loss(pred, target, bins))
        assert np.allclose(np.asarray(loss, dtype=np.float32),
                           np.asarray(ref, dtype=np.float32),
                           atol=atol, rtol=1e-4), (loss, ref)

    # 1) small shapes, single row-tile per batch element (rows=24 == full dim)
    check(seed=1, B=2, N=8, max_tile_rows=4096)
    # 2) multi-tile accumulation path (rows=192, tile=48, exact divisor, no mask)
    check(seed=2, B=2, N=64, max_tile_rows=48)
    # 3) ragged-tail masked path, no HBM padding (rows=60, tile=32 -> 2 tiles)
    check(seed=3, B=2, N=20, max_tile_rows=32)
    # 4) bf16 pred streamed natively, cast to f32 inside the kernel
    check(seed=4, B=2, N=16, max_tile_rows=4096, dtype=jnp.bfloat16)

    print("KERNEL_OK")
</pallas_src>

<mosaic_0001>
module attributes {stable_mosaic.version = 11 : i64} {
  func.func @kernel(%arg0: i32, %arg1: i32, %arg2: memref<1x24x100xf32, #tpu.memory_space<vmem>>, %arg3: memref<1x24x2xi32, #tpu.memory_space<vmem>>, %arg4: memref<1x1x2xf32, #tpu.memory_space<vmem>>) attributes {dimension_semantics = [#tpu.dimension_semantics<parallel>, #tpu.dimension_semantics<arbitrary>], iteration_bounds = array<i64: 2, 1>, scalar_prefetch = 0 : i64, scratch_operands = 0 : i64, tpu.core_type = #tpu.core_type<tc>, window_params = [{transform_indices = @transform_0, window_bounds = array<i64: 1, 24, 100>}, {transform_indices = @transform_1, window_bounds = array<i64: 1, 24, 2>}, {transform_indices = @transform_2, window_bounds = array<i64: 1, 1, 2>}]} {
    %c0_i32 = arith.constant 0 : i32
    %0 = arith.cmpi eq, %arg1, %c0_i32 : i32
    %1 = arith.extui %0 : i1 to i32
    %c0_i32_0 = arith.constant 0 : i32
    %2 = arith.cmpi ne, %1, %c0_i32_0 : i32
    scf.if %2 {
      %cst_21 = arith.constant 0.000000e+00 : f32
      %42 = vector.broadcast %cst_21 : f32 to vector<1x1x2xf32>
      %c0_22 = arith.constant 0 : index
      %c0_23 = arith.constant 0 : index
      %c0_24 = arith.constant 0 : index
      %43 = vector.load %arg4[%c0_22, %c0_23, %c0_24] : memref<1x1x2xf32, #tpu.memory_space<vmem>>, vector<1x1x2xf32>
      tpu.vector_store %arg4[%c0_22, %c0_23, %c0_24], %42 {strides = array<i32>} : memref<1x1x2xf32, #tpu.memory_space<vmem>>, vector<1x1x2xf32>,
    } else {
    }
    %c0 = arith.constant 0 : index
    %c0_1 = arith.constant 0 : index
    %c0_2 = arith.constant 0 : index
    %3 = vector.load %arg2[%c0, %c0_1, %c0_2] : memref<1x24x100xf32, #tpu.memory_space<vmem>>, vector<1x24x100xf32>
    %4 = vector.shape_cast %3 : vector<1x24x100xf32> to vector<24x100xf32>
    %cst = arith.constant dense<0xFF800000> : vector<24xf32>
    %5 = vector.multi_reduction <maximumf>, %4, %cst [1] : vector<24x100xf32> to vector<24xf32>
    %6 = vector.shape_cast %5 : vector<24xf32> to vector<24x1xf32>
    %7 = vector.broadcast %6 : vector<24x1xf32> to vector<24x100xf32>
    %8 = arith.subf %4, %7 : vector<24x100xf32>
    %9 = math.exp %8 : vector<24x100xf32>
    %cst_3 = arith.constant dense<0.000000e+00> : vector<24xf32>
    %10 = vector.multi_reduction <add>, %9, %cst_3 [1] : vector<24x100xf32> to vector<24xf32>
    %11 = vector.shape_cast %10 : vector<24xf32> to vector<24x1xf32>
    %12 = math.log %11 : vector<24x1xf32>
    %13 = arith.addf %6, %12 : vector<24x1xf32>
    %14 = tpu.iota {dimensions = array<i32: 1>} : vector<24x100xi32>
    %c0_4 = arith.constant 0 : index
    %c0_5 = arith.constant 0 : index
    %c0_6 = arith.constant 0 : index
    %15 = vector.load %arg3[%c0_4, %c0_5, %c0_6] : memref<1x24x2xi32, #tpu.memory_space<vmem>>, vector<1x24x1xi32>
    %16 = vector.shape_cast %15 : vector<1x24x1xi32> to vector<24x1xi32>
    %17 = vector.broadcast %16 : vector<24x1xi32> to vector<24x100xi32>
    %18 = arith.cmpi eq, %14, %17 : vector<24x100xi32>
    %cst_7 = arith.constant 0.000000e+00 : f32
    %19 = vector.broadcast %cst_7 : f32 to vector<24x100xf32>
    %20 = arith.select %18, %4, %19 : vector<24x100xi1>, vector<24x100xf32>
    %cst_8 = arith.constant dense<0.000000e+00> : vector<24xf32>
    %21 = vector.multi_reduction <add>, %20, %cst_8 [1] : vector<24x100xf32> to vector<24xf32>
    %22 = vector.shape_cast %21 : vector<24xf32> to vector<24x1xf32>
    %23 = arith.subf %13, %22 : vector<24x1xf32>
    %cst_9 = arith.constant dense<0.000000e+00> : vector<1xf32>
    %24 = vector.multi_reduction <add>, %23, %cst_9 [0] : vector<24x1xf32> to vector<1xf32>
    %25 = vector.shape_cast %24 : vector<1xf32> to vector<1x1xf32>
    %c0_10 = arith.constant 0 : index
    %c0_11 = arith.constant 0 : index
    %c1 = arith.constant 1 : index
    %26 = vector.load %arg3[%c0_10, %c0_11, %c1] : memref<1x24x2xi32, #tpu.memory_space<vmem>>, vector<1x24x1xi32>
    %27 = vector.shape_cast %26 : vector<1x24x1xi32> to vector<24x1xi32>
    %28 = vector.broadcast %27 : vector<24x1xi32> to vector<24x100xi32>
    %29 = arith.cmpi eq, %14, %28 : vector<24x100xi32>
    %cst_12 = arith.constant 0.000000e+00 : f32
    %30 = vector.broadcast %cst_12 : f32 to vector<24x100xf32>
    %31 = arith.select %29, %4, %30 : vector<24x100xi1>, vector<24x100xf32>
    %cst_13 = arith.constant dense<0.000000e+00> : vector<24xf32>
    %32 = vector.multi_reduction <add>, %31, %cst_13 [1] : vector<24x100xf32> to vector<24xf32>
    %33 = vector.shape_cast %32 : vector<24xf32> to vector<24x1xf32>
    %34 = arith.subf %13, %33 : vector<24x1xf32>
    %cst_14 = arith.constant dense<0.000000e+00> : vector<1xf32>
    %35 = vector.multi_reduction <add>, %34, %cst_14 [0] : vector<24x1xf32> to vector<1xf32>
    %36 = vector.shape_cast %35 : vector<1xf32> to vector<1x1xf32>
    %37 = tpu.concatenate %25, %36 in 1 : vector<1x1xf32>, vector<1x1xf32> -> vector<1x2xf32>
    %c0_15 = arith.constant 0 : index
    %c0_16 = arith.constant 0 : index
    %c0_17 = arith.constant 0 : index
    %38 = vector.load %arg4[%c0_15, %c0_16, %c0_17] : memref<1x1x2xf32, #tpu.memory_space<vmem>>, vector<1x1x2xf32>
    %39 = vector.shape_cast %37 : vector<1x2xf32> to vector<1x1x2xf32>
    %40 = arith.addf %38, %39 : vector<1x1x2xf32>
    %c0_18 = arith.constant 0 : index
    %c0_19 = arith.constant 0 : index
    %c0_20 = arith.constant 0 : index
    %41 = vector.load %arg4[%c0_18, %c0_19, %c0_20] : memref<1x1x2xf32, #tpu.memory_space<vmem>>, vector<1x1x2xf32>
    tpu.vector_store %arg4[%c0_18, %c0_19, %c0_20], %40 {strides = array<i32>} : memref<1x1x2xf32, #tpu.memory_space<vmem>>, vector<1x1x2xf32>,
    return
  }
  func.func @transform_0(%arg0: i32, %arg1: i32) -> (i32, i32, i32) {
    %c0_i32 = arith.constant 0 : i32
    %c0_i32_0 = arith.constant 0 : i32
    return %arg0, %arg1, %c0_i32 : i32, i32, i32
  }
  func.func @transform_1(%arg0: i32, %arg1: i32) -> (i32, i32, i32) {
    %c0_i32 = arith.constant 0 : i32
    %c0_i32_0 = arith.constant 0 : i32
    return %arg0, %arg1, %c0_i32 : i32, i32, i32
  }
  func.func @transform_2(%arg0: i32, %arg1: i32) -> (i32, i32, i32) {
    %c0_i32 = arith.constant 0 : i32
    %c0_i32_0 = arith.constant 0 : i32
    %c0_i32_1 = arith.constant 0 : i32
    return %arg0, %c0_i32, %c0_i32_0 : i32, i32, i32
  }
}

</mosaic_0001>

<bundles_post_ra>
// kernel: tpu_custom_call.1
= control target key start
LH: loop header
LB: loop body
LE: loop exit
PB: predicated region body
PF: predicated region fallthrough
CT: control target
= control target key end

     0   :  { %7 = vsyncpa [#allocation3], 0  ;;  %s758_s0 = inlined_call_operand.vmem [shape: f32[2,24,100], index: 0, kind: input, shape index: {}]   ;;  %s759_s1 = inlined_call_operand.vmem [shape: s32[2,24,2], index: 1, kind: input, shape index: {}]   ;;  %s760_s2 = inlined_call_operand.hbm [shape: f32[2,1,2], index: 2, kind: output, shape index: {}]  }
   0x1   :  { %9 = vsyncpa [#allocation3 + $0x1], 0  ;;  %s616_s9 = smov 0   ;;  %s618_s10 = smov 0  }
   0x2   :  { %s620_s11 = smov 0   ;;  %s622_s12 = smov 0  }
   0x3   :  { %s624_s13 = smov 0   ;;  %s626_s14 = smov 0  }
   0x4 LB: > { %s432_s15 = sadd.s32 4294967295, %s596_s14   ;;  %s433_s16 = sadd.s32 4294967294, %s596_s14   ;;  %s596_s14 = sphi %s626_s14, %s15_s14   ;;  %s592_s13 = sphi %s624_s13, %s767_s13   ;;  %s588_s12 = sphi %s622_s12, %s766_s12   ;;  %s584_s11 = sphi %s620_s11, %s765_s11   ;;  %s580_s10 = sphi %s618_s10, %s764_s10   ;;  %s576_s9 = sphi %s616_s9, %s763_s9  }
   0x5   : > { %s27_s17 = sadd.s32 1, %s592_s13  ;;  %s90_s18 = sadd.s32 1, %s584_s11 }
   0x6   : > { %p29_p0 = scmp.ge.s32.totalorder %s27_s17, 2  ;;  %p100_p1 = scmp.ne.s32.totalorder %s584_s11, %s580_s10 }
   0x7   : > { %p101_p2 = scmp.eq.s32.totalorder %s432_s15, 1  ;;  %p106_p3 = scmp.ne.s32.totalorder %s580_s10, %s576_s9 }
   0x8   : > { %s769_s17 = smov (%p29_p0, %s27_s17), 0  ;;  %p107_p5 = scmp.eq.s32.totalorder %s433_s16, 1 }
   0x9   : > { %p656_p4 = por %p101_p2, %p100_p1  ;;  %s87_s20 = ssub.s32 %s592_s13, %s769_s17 }
   0xa   : > { %p436_p6 = scmp.ge.s32.totalorder %s596_s14, 1  ;;  %p88_p7 = scmp.eq.s32.totalorder %s87_s20, 0 }
   0xb   : > { %p663_p8 = por %p107_p5, %p106_p3  ;;  %p151_p9 = scmp.lt.s32.totalorder %s596_s14, 3 }
   0xc   : > { %s669_s22 = scalar_select %p88_p7, %s584_s11, %s90_s18  }
   0xd   : > { %p152_p10 = pnand %p436_p6, %p151_p9 }
   0xe   : > { %p186_p11 = scmp.lt.s32.totalorder (!%p152_p10), %s588_s12, 1  ;;  %s183_s3 = sand.u32 (!%p152_p10), 1, %s580_s10  }
   0xf   : > { %155 = sbr.rel (%p152_p10) target bundleno = 325 (0x145), region = 28  ;;  %s709_s4 = scalar_lea.vmem (!%p152_p10), [#allocation2], %s183_s3 }
  0x10   : > { %s341_s7 = scalar_lea.hbm (!%p152_p10), %s760_s2, %s588_s12  ;;  %s343_s8 = sshll.u32 (!%p152_p10), %s709_s4, 4  ;;  %s344_s8 = int_to_ptr.vmem [resolvable:$true] %s343_s8 }
  0x11   : > { %s345_s15 = sshll.u32 (!%p152_p10), %s341_s7, 4  ;;  %s333_s16 = scalar_lea.sflag (!%p152_p10), [#allocation3], %s183_s3  ;;  %s346_s15 = int_to_ptr.hbm [resolvable:$true] %s345_s15 }
  0x12   : > { %s532_s18 = sshra.s32 (!%p152_p10), %s346_s15, 4  ;;  %s533_s18 = int_to_ptr.hbm [resolvable:$true] %s532_s18 }
  0x13   : > { %s534_s20 = scalar_lea.hbm (!%p152_p10), %s533_s18, 1  ;;  %p539_p1 = scmp.lt.s32.totalorder (!%p152_p10), %s533_s18, %s760_s2 }
  0x14   : > { %v598_v0 = vmov 0   ;;  %s187_s23 = scalar_select %p186_p11, %s588_s12, 1  ;;  %v599_v1 = vmov 1   ;;  %vm214_vm0 = vcmask 818176   ;;  %v251_v26 = vlaneseq }
  0x15   : > { %500 = vset.pattern.permute.xlu1 %v598_v0  ;;  %501 = vset.pattern.permute.xlu2 %v598_v0  ;;  %vm209_vm7 = vcmask 8192   ;;  %v600_v48 = vmov 0.0   ;;  %vm326_vm8 = vcmask 7168   ;;  %p535_p12 = scmp.ne.s32.totalorder %s533_s18, %s534_s20 }
  0x16   : > { %503 = vset.pattern.permute.xlu0 %v599_v1  ;;  %s441_s24 = smul.u32 24, %s187_s23  ;;  %v252_v27 = vand.u32 127, %v251_v26  ;;  %210 = vst.msk [vmem:[%s709_s4] sm:$0x1] %vm209_vm7, %v600_v48 }
  0x17   : > { %p536_p13 = pnand %p535_p12, %p656_p4 }
  0x18   : > { %s193_s27 = scalar_lea.vmem %s758_s0, %s441_s24  ;;  %s203_s30 = scalar_lea.vmem %s759_s1, %s441_s24 }
  0x19   : > { %v676_v2 = vld [vmem:[%s193_s27 + $0x10] sm:$0xff]  ;;  %v211_v3 = vld [vmem:[%s193_s27] sm:$0xff]  ;;  %v254_v6 = vld [vmem:[%s203_s30 + $0x8] sm:$0xff]  ;;  %p537_p0 = pneg %p536_p13  ;;  %s538_s24 = scalar_lea.hbm %s760_s2, 2 }
  0x1a   : > { %v221_v4 = vsel %vm214_vm0, %v676_v2, -inf  ;;  %v215_v5 = vsel %vm214_vm0, %v211_v3, -inf  ;;  %260 = vperm.xlu2 %501, %v254_v6   ;;  %v212_v7 = vld [vmem:[%s193_s27 + $0x8] sm:$0xff]  ;;  %v253_v9 = vld [vmem:[%s203_s30] sm:$0xff]  ;;  %v255_v10 = vld [vmem:[%s203_s30 + $0x10] sm:$0xff]  ;;  %p540_p2 = scmp.lt.s32.totalorder %s538_s24, %s534_s20 }
  0x1b   : > { %222 = vmax.xlane.f32.xlu1 %v221_v4  ;;  %216 = vmax.xlane.f32.xlu0 %v215_v5  ;;  %v218_v8 = vsel %vm214_vm0, %v212_v7, -inf }
  0x1c   : > { %p541_p3 = por %p540_p2, %p539_p1 }
  0x1e   : > { %p542_p5 = pnand %p541_p3, %p537_p0 }
  0x22   : > { %502 = vset.pattern.permute.xlu2 %v599_v1 }
  0x23   : > { %219 = vmax.xlane.f32.xlu0 %v218_v8  ;;  %292 = vperm.xlu2 %502, %v253_v9  }
  0x2b   : > { %504 = vset.pattern.permute.xlu2 %v598_v0 }
  0x2c   : > { %263 = vperm.xlu2 %504, %v255_v10  }
  0x34   : > { %257 = vperm.xlu1 %500, %v253_v9   ;;  %505 = vset.pattern.permute.xlu2 %v599_v1 }
  0x35   : > { %298 = vperm.xlu2 %505, %v255_v10  }
  0x37   : > { %295 = vperm.xlu0 %503, %v254_v6  }
  0x74   : > { %v261_v17 = vpop.permute.xlu2 %260 }
  0x75   : > { %vm266_vm1 = vcmp.eq.s32.totalorder %v252_v27, %v261_v17 }
  0x76   : > { %v269_v32 = vsel %vm266_vm1, %v212_v7, 0.0 }
  0x77   : > { %v274_v36 = vsel %vm214_vm0, %v269_v32, 0.0 }
  0x7d   : > { %v293_v25 = vpop.permute.xlu2 %292 }
  0x7e   : > { %vm300_vm4 = vcmp.eq.s32.totalorder %v252_v27, %v293_v25 }
  0x7f   : > { %v303_v38 = vsel %vm300_vm4, %v211_v3, 0.0 }
  0x80   : > { %v306_v41 = vsel %vm214_vm0, %v303_v38, 0.0 }
  0x86   : > { %v264_v30 = vpop.permute.xlu2 %263 }
  0x87   : > { %vm267_vm6 = vcmp.eq.s32.totalorder %v252_v27, %v264_v30 }
  0x88   : > { %v270_v43 = vsel %vm267_vm6, %v676_v2, 0.0 }
  0x89   : > { %v277_v45 = vsel %vm214_vm0, %v270_v43, 0.0 }
  0x8e   : > { %v685_v11 = vpop.xlane.xlu1 %222  ;;  %v687_v12 = vpop.xlane.xlu0 %216 }
  0x8f   : > { %v226_v13 = vsub.f32 %v676_v2, %v685_v11  ;;  %v224_v14 = vsub.f32 %v211_v3, %v687_v12  ;;  %v299_v39 = vpop.permute.xlu2 %298 }
  0x90   : > { %vm302_vm5 = vcmp.eq.s32.totalorder %v252_v27, %v299_v39 }
  0x91   : > { %v231_v15 = vmul.f32 1.442695, %v226_v13  ;;  %v227_v16 = vmul.f32 1.442695, %v224_v14  ;;  %v305_v42 = vsel %vm302_vm5, %v676_v2, 0.0 }
  0x92   : > { %v312_v44 = vsel %vm214_vm0, %v305_v42, 0.0 }
  0x93   : > { %506 = vpow2.f32 %v231_v15 }
  0x94   : > { %508 = vpow2.f32 %v227_v16 }
  0x96   : > { %v692_v18 = vpop.xlane.xlu0 %219 }
  0x97   : > { %v225_v19 = vsub.f32 %v212_v7, %v692_v18 }
  0x99   : > { %v507_v20 = vpop.eup %506  ;;  %v229_v21 = vmul.f32 1.442695, %v225_v19 }
  0x9a   : > { %v509_v22 = vpop.eup %508  ;;  %v239_v23 = vsel %vm214_vm0, %v507_v20, 0.0 }
  0x9b   : > { %510 = vpow2.f32 %v229_v21  ;;  %240 = vadd.xlane.f32.xlu0 %v239_v23  ;;  %v233_v24 = vsel %vm214_vm0, %v509_v22, 0.0  ;;  %v328_v23 = vld [vmem:[%s709_s4] sm:$0x1] }
  0x9c   : > { %234 = vadd.xlane.f32.xlu2 %v233_v24 }
  0xa1   : > { %v511_v28 = vpop.eup %510 }
  0xa2   : > { %v236_v29 = vsel %vm214_vm0, %v511_v28, 0.0 }
  0xa3   : > { %237 = vadd.xlane.f32.xlu1 %v236_v29 }
  0xa6   : > { %v258_v31 = vpop.permute.xlu1 %257 }
  0xa7   : > { %vm265_vm2 = vcmp.eq.s32.totalorder %v252_v27, %v258_v31 }
  0xa8   : > { %v268_v33 = vsel %vm265_vm2, %v211_v3, 0.0 }
  0xa9   : > { %v271_v34 = vsel %vm214_vm0, %v268_v33, 0.0  ;;  %v296_v35 = vpop.permute.xlu0 %295 }
  0xaa   : > { %272 = vadd.xlane.f32.xlu2 %v271_v34  ;;  %vm301_vm3 = vcmp.eq.s32.totalorder %v252_v27, %v296_v35 }
  0xab   : > { %275 = vadd.xlane.f32.xlu1 %v274_v36  ;;  %v304_v37 = vsel %vm301_vm3, %v212_v7, 0.0 }
  0xac   : > { %v309_v40 = vsel %vm214_vm0, %v304_v37, 0.0 }
  0xb2   : > { %307 = vadd.xlane.f32.xlu2 %v306_v41 }
  0xb3   : > { %310 = vadd.xlane.f32.xlu1 %v309_v40 }
  0xba   : > { %278 = vadd.xlane.f32.xlu2 %v277_v45 }
  0xbb   : > { %313 = vadd.xlane.f32.xlu1 %v312_v44 }
 0x10e   : > { %v241_v49 = vpop.xlane.xlu0 %240 }
 0x10f   : > { %v235_v46 = vpop.xlane.xlu2 %234 }
 0x116   : > { %v238_v47 = vpop.xlane.xlu1 %237 }
 0x117   : > { %512 = vlog2.f32 %v238_v47 }
 0x118   : > { %514 = vlog2.f32 %v235_v46 }
 0x119   : > { %516 = vlog2.f32 %v241_v49 }
 0x11d   : > { %v273_v50 = vpop.xlane.xlu2 %272  ;;  %v513_v52 = vpop.eup %512 }
 0x11e   : > { %v276_v51 = vpop.xlane.xlu1 %275  ;;  %v515_v53 = vpop.eup %514  ;;  %v245_v54 = vmul.f32 0.6931472, %v513_v52 }
 0x11f   : > { %v517_v55 = vpop.eup %516  ;;  %v243_v56 = vmul.f32 0.6931472, %v515_v53 }
 0x120   : > { %v249_v58 = vadd.f32 %v245_v54, %v692_v18  ;;  %v247_v60 = vmul.f32 0.6931472, %v517_v55 }
 0x121   : > { %v248_v61 = vadd.f32 %v243_v56, %v687_v12 }
 0x122   : > { %v281_v62 = vsub.f32 %v249_v58, %v276_v51  ;;  %v250_v2 = vadd.f32 %v247_v60, %v685_v11 }
 0x123   : > { %v280_v1 = vsub.f32 %v248_v61, %v273_v50 }
 0x125   : > { %v308_v57 = vpop.xlane.xlu2 %307  ;;  %v283_v4 = vadd.f32 %v281_v62, %v280_v1 }
 0x126   : > { %v311_v59 = vpop.xlane.xlu1 %310  ;;  %v315_v63 = vsub.f32 %v248_v61, %v308_v57 }
 0x127   : > { %v316_v0 = vsub.f32 %v249_v58, %v311_v59 }
 0x129   : > { %v318_v7 = vadd.f32 %v316_v0, %v315_v63 }
 0x12d   : > { %v279_v3 = vpop.xlane.xlu2 %278 }
 0x12e   : > { %v282_v5 = vsub.f32 %v250_v2, %v279_v3  ;;  %v314_v6 = vpop.xlane.xlu1 %313 }
 0x12f   : > { %v317_v8 = vsub.f32 %v250_v2, %v314_v6 }
 0x130   : > { %v284_v9 = vadd.f32 %v283_v4, %v282_v5 }
 0x131   : > { %v319_v10 = vadd.f32 %v318_v7, %v317_v8 }
 0x132   : > { %v285_v13 = vrot.slane %v284_v9, 4 }
 0x133   : > { %v320_v14 = vrot.slane %v319_v10, 4 }
 0x134   : > { %v286_v12 = vadd.f32 %v285_v13, %v284_v9 }
 0x135   : > { %v321_v15 = vadd.f32 %v320_v14, %v319_v10 }
 0x136   : > { %v287_v16 = vrot.slane %v286_v12, 2 }
 0x137   : > { %v322_v17 = vrot.slane %v321_v15, 2 }
 0x138   : > { %v288_v18 = vadd.f32 %v287_v16, %v286_v12 }
 0x139   : > { %v323_v11 = vadd.f32 %v322_v17, %v321_v15 }
 0x13a   : > { %v289_v19 = vrot.slane %v288_v18, 1 }
 0x13b   : > { %v324_v20 = vrot.slane %v323_v11, 1 }
 0x13c   : > { %v290_v21 = vadd.f32 %v289_v19, %v288_v18 }
 0x13d   : > { %v325_v22 = vadd.f32 %v324_v20, %v323_v11 }
 0x13f   : > { %v327_v24 = vsel %vm326_vm8, %v290_v21, %v325_v22 }
 0x140   : > { %v329_v25 = vadd.f32 %v328_v23, %v327_v24 }
 0x142   : > { %331 = vst.msk [vmem:[%s709_s4] sm:$0x1] %vm209_vm7, %v329_v25 }
 0x143   : > { %545 = shalt.err (!%p542_p5)
}
 0x144   : > { %442 = dma.vmem_to_hbm [thread:$0]  (%p656_p4), %s344_s8, 16, %s346_s15, %s333_s16  }
 0x145 PF: > { %p448_p6 = scmp.ge.s32.totalorder %s596_s14, 2  ;;  %s357_s27 = sand.u32 1, %s576_s9  }
 0x146   : > { %s358_s28 = scalar_lea.sflag [#allocation3], %s357_s27 }
 0x147   : > { %p445_p7 = pnand %p448_p6, %p663_p8 }
 0x149   : > { %p446_p9 = pneg %p445_p7 }
 0x14b   : > { %571 = dma.done.wait (%p446_p9), %s358_s28, 16  }
 0x14c   : > { %573 = vsyncadd (%p446_p9), %s358_s28, 4294967280  ;;  %s15_s14 = sadd.s32 1, %s596_s14   ;;  %s763_s9 = smov %s580_s10 }
 0x14d   : > { %p12_p10 = scmp.ge.s32.totalorder %s15_s14, 4   ;;  %s764_s10 = smov %s584_s11 }
 0x14e   : > { %s765_s11 = smov %s669_s22  ;;  %s766_s12 = smov %s592_s13 }
 0x14f   : > { %s767_s13 = smov %s769_s17  ;;  %14 = sbr.rel (!%p12_p10) target bundleno = 4 (0x4), region = 70 }
 0x154   :  { %363 = vsyncpa [#allocation3], 1 }
 0x155   :  { %365 = vsyncpa [#allocation3 + $0x1], 1 }

</bundles_post_ra>
